<compile_context>
chip_gen: v7x
topology: tpu7x:2x2x1
jax: 0.10.0
libtpu: 0.0.40
codegen_flags: <defaults>
</compile_context>

<pallas_src>
import functools

import jax
import jax.numpy as jnp
from jax.experimental import pallas as pl
from jax.experimental.pallas import tpu as pltpu

_VMEM_LIMIT = 64 * 1024 * 1024  # raise scoped-VMEM default; still v7x-safe here


# ----------------------------- Pallas kernels ------------------------------

def _qkv_proj_kernel(q_ref, k_ref, v_ref, wq_ref, wk_ref, wv_ref, b_ref,
                     qo_ref, ko_ref, vo_ref):
    # Weights are pre-transposed in the wrapper, so y = x @ Wt + b (no in-kernel
    # transpose). MXU fed in the input dtype; accumulate in f32.
    qo_ref[...] = (jnp.dot(q_ref[...], wq_ref[...],
                           preferred_element_type=jnp.float32)
                   + b_ref[0]).astype(qo_ref.dtype)
    ko_ref[...] = (jnp.dot(k_ref[...], wk_ref[...],
                           preferred_element_type=jnp.float32)
                   + b_ref[1]).astype(ko_ref.dtype)
    vo_ref[...] = (jnp.dot(v_ref[...], wv_ref[...],
                           preferred_element_type=jnp.float32)
                   + b_ref[2]).astype(vo_ref.dtype)


def _linear_kernel(x_ref, wt_ref, b_ref, o_ref):
    # Fallback single projection (used only when T_q != T_k).
    o_ref[...] = (jnp.dot(x_ref[...], wt_ref[...],
                          preferred_element_type=jnp.float32)
                  + b_ref[...]).astype(o_ref.dtype)


def _attn_ln_kernel(q_ref, k_ref, v_ref, res_ref, g_ref, b_ref,
                    out_ref, attn_ref, *, scale):
    # One (batch, raw-head block) per grid step: th head-slabs of this batch.
    q = q_ref[...] * jnp.asarray(scale, dtype=q_ref.dtype)    # (th, Tq, d)
    k = k_ref[...]                                            # (th, Tk, d)
    v = v_ref[...]                                            # (th, Tk, d)

    # Scores + softmax (attn_mask=None path); f32 accumulation on the MXU.
    s = jnp.einsum("hqd,hkd->hqk", q, k,
                   preferred_element_type=jnp.float32)        # (th, Tq, Tk)
    m = jnp.max(s, axis=-1, keepdims=True)
    e = jnp.exp(s - m)
    # Exact normalization (matches torch F.softmax within f32 rounding).
    p = e / jnp.sum(e, axis=-1, keepdims=True)

    # Single down-cast of p, reused for both the stored probs and the PV matmul.
    p_lo = p.astype(v.dtype)
    attn_ref[...] = p_lo.astype(attn_ref.dtype)               # input dtype

    # attention dropout_rate == 0.0 -> identity.
    ctx = jnp.einsum("hqk,hkd->hqd", p_lo, v,
                     preferred_element_type=jnp.float32)      # (th, Tq, d) f32

    # context.view(B, -1, D) restricted to this raw-head block is a raw
    # row-major reshape of the (th, Tq, d) slab into (th*Tq/H, D) whole output
    # rows -- exact match to torch .view() for this contiguous head range.
    D = g_ref.shape[-1]
    x = res_ref[0].astype(jnp.float32) + ctx.reshape(-1, D)

    # output dropout_rate == 0.0 -> identity; LayerNorm (eps=1e-5),
    # one-pass stats: var = E[x^2] - mean^2 (single cross-lane reduce pair).
    mean = jnp.mean(x, axis=-1, keepdims=True)
    msq = jnp.mean(x * x, axis=-1, keepdims=True)
    var = jnp.maximum(msq - mean * mean, 0.0)
    y = (x - mean) * jax.lax.rsqrt(var + 1e-5)
    out_ref[0] = (y * g_ref[...] + b_ref[...]).astype(out_ref.dtype)


# ------------------------------ wrappers ------------------------------------

def pallas_qkv_projection(q2d, k2d, v2d, wts, b_stk, *, row_tile=512):
    """Fused q/k/v projections in a single row-tiled pallas_call."""
    N, D = q2d.shape
    tm = N if N <= row_tile else row_tile
    row_spec = pl.BlockSpec((tm, D), lambda i: (i, 0))
    w_spec = pl.BlockSpec((D, D), lambda i: (0, 0))
    b_spec = pl.BlockSpec((3, 1, D), lambda i: (0, 0, 0))
    return pl.pallas_call(
        _qkv_proj_kernel,
        out_shape=(jax.ShapeDtypeStruct((N, D), q2d.dtype),
                   jax.ShapeDtypeStruct((N, D), k2d.dtype),
                   jax.ShapeDtypeStruct((N, D), v2d.dtype)),
        grid=(pl.cdiv(N, tm),),
        in_specs=[row_spec, row_spec, row_spec, w_spec, w_spec, w_spec, b_spec],
        out_specs=[row_spec, row_spec, row_spec],
        compiler_params=pltpu.CompilerParams(
            dimension_semantics=("parallel",),
            vmem_limit_bytes=_VMEM_LIMIT),
    )(q2d, k2d, v2d, wts[0], wts[1], wts[2], b_stk)


def pallas_linear(x2d, wt, b, *, row_tile=512):
    """Row-tiled y = x @ Wt + b (fallback when T_q != T_k)."""
    N, D = x2d.shape
    Dout = wt.shape[1]
    tm = N if N <= row_tile else row_tile
    return pl.pallas_call(
        _linear_kernel,
        out_shape=jax.ShapeDtypeStruct((N, Dout), x2d.dtype),
        grid=(pl.cdiv(N, tm),),
        in_specs=[pl.BlockSpec((tm, D), lambda i: (i, 0)),
                  pl.BlockSpec((D, Dout), lambda i: (0, 0)),
                  pl.BlockSpec((1, Dout), lambda i: (0, 0))],
        out_specs=pl.BlockSpec((tm, Dout), lambda i: (i, 0)),
        compiler_params=pltpu.CompilerParams(
            dimension_semantics=("parallel",),
            vmem_limit_bytes=_VMEM_LIMIT),
    )(x2d, wt, b.reshape(1, Dout))


def _pick_head_block(num_heads, t_q):
    """Smallest # of raw heads per grid step whose context maps to whole,
    8-row-aligned output rows (required by the raw .view semantics and the
    (8,128) block constraint). Falls back to all heads (always valid)."""
    for th in range(1, num_heads):
        if num_heads % th:
            continue
        if (th * t_q) % num_heads:
            continue
        rows = (th * t_q) // num_heads
        if rows % 8 == 0:
            return th
    return num_heads


def pallas_attention_ln(qh, kh, vh, residual, gamma, beta, num_heads):
    """Fused scaled-dot attention + residual add + LayerNorm.

    Grid = (batch, raw-head blocks): caps per-step VMEM at th*Tq*Tk f32 scores
    and provides B*H/th parallel grid points (megacore / v7x dual-TC)."""
    HB, Tq, d = qh.shape
    _, Tk, _ = kh.shape
    B, Tres, D = residual.shape
    H = num_heads
    th = _pick_head_block(H, Tq)      # raw heads per grid step
    n_hb = H // th                    # head blocks per batch
    rows = (th * Tq) // H             # whole output rows produced per step
    scale = float(d) ** (-0.5)
    kernel = functools.partial(_attn_ln_kernel, scale=scale)
    out, attn = pl.pallas_call(
        kernel,
        out_shape=(jax.ShapeDtypeStruct((B, Tres, D), residual.dtype),
                   jax.ShapeDtypeStruct((HB, Tq, Tk), qh.dtype)),
        grid=(B, n_hb),
        in_specs=[pl.BlockSpec((th, Tq, d), lambda b, h: (b * n_hb + h, 0, 0)),
                  pl.BlockSpec((th, Tk, d), lambda b, h: (b * n_hb + h, 0, 0)),
                  pl.BlockSpec((th, Tk, d), lambda b, h: (b * n_hb + h, 0, 0)),
                  pl.BlockSpec((1, rows, D), lambda b, h: (b, h, 0)),
                  pl.BlockSpec((1, D), lambda b, h: (0, 0)),
                  pl.BlockSpec((1, D), lambda b, h: (0, 0))],
        out_specs=[pl.BlockSpec((1, rows, D), lambda b, h: (b, h, 0)),
                   pl.BlockSpec((th, Tq, Tk), lambda b, h: (b * n_hb + h, 0, 0))],
        compiler_params=pltpu.CompilerParams(
            dimension_semantics=("parallel", "parallel"),
            vmem_limit_bytes=_VMEM_LIMIT),
    )(qh, kh, vh, residual, gamma.reshape(1, D), beta.reshape(1, D))
    return out, attn


def multi_head_attention(q, k, v, params, num_heads):
    """Forward pass matching MultiHeadAttention.forward (attn_mask=None)."""
    B, Tq, D = q.shape
    d = D // num_heads

    # Static weight prep (one-time): nn.Linear stores W as (out,in) -> transpose.
    wts = jnp.stack([params["wq"].T, params["wk"].T, params["wv"].T])   # (3,D,D)
    b_stk = jnp.stack([params["bq"], params["bk"], params["bv"]])[:, None, :]

    q2d = q.reshape(B * Tq, D)
    k2d = k.reshape(-1, D)
    v2d = v.reshape(-1, D)

    if q2d.shape == k2d.shape:
        qp, kp, vp = pallas_qkv_projection(q2d, k2d, v2d, wts, b_stk)
    else:
        # Cross-attention with T_q != T_k: run the projections separately.
        qp = pallas_linear(q2d, wts[0], params["bq"])
        kp = pallas_linear(k2d, wts[1], params["bk"])
        vp = pallas_linear(v2d, wts[2], params["bv"])

    # Raw row-major head split, exactly like torch's .view(num_heads*B, -1, d).
    qh = qp.reshape(num_heads * B, -1, d)
    kh = kp.reshape(num_heads * B, -1, d)
    vh = vp.reshape(num_heads * B, -1, d)

    out, attn = pallas_attention_ln(qh, kh, vh, q, params["gamma"],
                                    params["beta"], num_heads)
    return out, attn


# ------------------------------ reference -----------------------------------

def reference_forward(q, k, v, params, num_heads):
    B, T, D = q.shape
    d = D // num_heads
    residual = q
    qq = q @ params["wq"].T + params["bq"]
    kk = k @ params["wk"].T + params["bk"]
    vv = v @ params["wv"].T + params["bv"]
    qh = qq.reshape(num_heads * B, -1, d)
    kh = kk.reshape(num_heads * B, -1, d)
    vh = vv.reshape(num_heads * B, -1, d)
    s = jnp.einsum("btd,bsd->bts", qh, kh) * (d ** -0.5)
    p = jax.nn.softmax(s, axis=-1)
    ctx = jnp.einsum("bts,bsd->btd", p, vh).reshape(B, -1, D)
    x = residual + ctx
    mean = x.mean(-1, keepdims=True)
    var = ((x - mean) ** 2).mean(-1, keepdims=True)
    out = (x - mean) / jnp.sqrt(var + 1e-5) * params["gamma"] + params["beta"]
    return out, p


# -------------------------------- main ---------------------------------------

if __name__ == "__main__":
    # Small shapes consistent with the module.
    B, T, model_dim, num_heads = 2, 8, 32, 4

    key = jax.random.PRNGKey(0)
    ks = jax.random.split(key, 9)
    scale = 1.0 / jnp.sqrt(model_dim)

    params = {
        "wq": jax.random.normal(ks[0], (model_dim, model_dim), jnp.float32) * scale,
        "bq": jax.random.normal(ks[1], (model_dim,), jnp.float32) * 0.1,
        "wk": jax.random.normal(ks[2], (model_dim, model_dim), jnp.float32) * scale,
        "bk": jax.random.normal(ks[3], (model_dim,), jnp.float32) * 0.1,
        "wv": jax.random.normal(ks[4], (model_dim, model_dim), jnp.float32) * scale,
        "bv": jax.random.normal(ks[5], (model_dim,), jnp.float32) * 0.1,
        # nn.LayerNorm defaults: weight=1, bias=0 (deterministic)
        "gamma": jnp.ones((model_dim,), jnp.float32),
        "beta": jnp.zeros((model_dim,), jnp.float32),
    }

    q = jax.random.normal(ks[6], (B, T, model_dim), jnp.float32)
    k = jax.random.normal(ks[7], (B, T, model_dim), jnp.float32)
    v = jax.random.normal(ks[8], (B, T, model_dim), jnp.float32)

    out, attn = multi_head_attention(q, k, v, params, num_heads)
    out = jax.block_until_ready(out)
    attn = jax.block_until_ready(attn)

    # Sanity check against a pure-JAX reference. Softmax normalization is now
    # exact, so both outputs match within f32 rounding / accumulation order.
    ref_out, ref_attn = reference_forward(q, k, v, params, num_heads)
    assert out.shape == (B, T, model_dim)
    assert attn.shape == (num_heads * B, T, T)
    assert jnp.allclose(attn, ref_attn, atol=1e-3, rtol=1e-3)
    assert jnp.allclose(out, ref_out, atol=3e-3, rtol=3e-3)

    print("KERNEL_OK")
</pallas_src>

<mosaic_0001>
module attributes {stable_mosaic.version = 11 : i64} {
  func.func @_qkv_proj_kernel(%arg0: i32, %arg1: memref<16x32xf32, #tpu.memory_space<vmem>>, %arg2: memref<16x32xf32, #tpu.memory_space<vmem>>, %arg3: memref<16x32xf32, #tpu.memory_space<vmem>>, %arg4: memref<32x32xf32, #tpu.memory_space<vmem>>, %arg5: memref<32x32xf32, #tpu.memory_space<vmem>>, %arg6: memref<32x32xf32, #tpu.memory_space<vmem>>, %arg7: memref<3x1x32xf32, #tpu.memory_space<vmem>>, %arg8: memref<16x32xf32, #tpu.memory_space<vmem>>, %arg9: memref<16x32xf32, #tpu.memory_space<vmem>>, %arg10: memref<16x32xf32, #tpu.memory_space<vmem>>) attributes {dimension_semantics = [#tpu.dimension_semantics<parallel>], iteration_bounds = array<i64: 1>, scalar_prefetch = 0 : i64, scratch_operands = 0 : i64, tpu.core_type = #tpu.core_type<tc>, window_params = [{transform_indices = @transform_0, window_bounds = array<i64: 16, 32>}, {transform_indices = @transform_1, window_bounds = array<i64: 16, 32>}, {transform_indices = @transform_2, window_bounds = array<i64: 16, 32>}, {pipeline_mode = #tpu.pipeline_mode<synchronous>, transform_indices = @transform_3, window_bounds = array<i64: 32, 32>}, {pipeline_mode = #tpu.pipeline_mode<synchronous>, transform_indices = @transform_4, window_bounds = array<i64: 32, 32>}, {pipeline_mode = #tpu.pipeline_mode<synchronous>, transform_indices = @transform_5, window_bounds = array<i64: 32, 32>}, {pipeline_mode = #tpu.pipeline_mode<synchronous>, transform_indices = @transform_6, window_bounds = array<i64: 3, 1, 32>}, {transform_indices = @transform_7, window_bounds = array<i64: 16, 32>}, {transform_indices = @transform_8, window_bounds = array<i64: 16, 32>}, {transform_indices = @transform_9, window_bounds = array<i64: 16, 32>}]} {
    %c0 = arith.constant 0 : index
    %c0_0 = arith.constant 0 : index
    %0 = vector.load %arg1[%c0, %c0_0] : memref<16x32xf32, #tpu.memory_space<vmem>>, vector<16x32xf32>
    %c0_1 = arith.constant 0 : index
    %c0_2 = arith.constant 0 : index
    %1 = vector.load %arg4[%c0_1, %c0_2] : memref<32x32xf32, #tpu.memory_space<vmem>>, vector<32x32xf32>
    %cst = arith.constant dense<0.000000e+00> : vector<16x32xf32>
    %2 = tpu.matmul %0, %1, %cst {dimension_numbers = #tpu.dot_dimension_numbers<[1], [0], [0], [1], [0, 0, 1, 1], [], []>} : vector<16x32xf32>, vector<32x32xf32>, vector<16x32xf32> -> vector<16x32xf32>
    %c0_3 = arith.constant 0 : index
    %c0_4 = arith.constant 0 : index
    %c0_5 = arith.constant 0 : index
    %3 = vector.load %arg7[%c0_3, %c0_4, %c0_5] : memref<3x1x32xf32, #tpu.memory_space<vmem>>, vector<1x1x32xf32>
    %4 = vector.shape_cast %3 : vector<1x1x32xf32> to vector<1x32xf32>
    %5 = vector.broadcast %4 : vector<1x32xf32> to vector<16x32xf32>
    %6 = arith.addf %2, %5 : vector<16x32xf32>
    %c0_6 = arith.constant 0 : index
    %c0_7 = arith.constant 0 : index
    %7 = vector.load %arg8[%c0_6, %c0_7] : memref<16x32xf32, #tpu.memory_space<vmem>>, vector<16x32xf32>
    tpu.vector_store %arg8[%c0_6, %c0_7], %6 {strides = array<i32>} : memref<16x32xf32, #tpu.memory_space<vmem>>, vector<16x32xf32>,
    %c0_8 = arith.constant 0 : index
    %c0_9 = arith.constant 0 : index
    %8 = vector.load %arg2[%c0_8, %c0_9] : memref<16x32xf32, #tpu.memory_space<vmem>>, vector<16x32xf32>
    %c0_10 = arith.constant 0 : index
    %c0_11 = arith.constant 0 : index
    %9 = vector.load %arg5[%c0_10, %c0_11] : memref<32x32xf32, #tpu.memory_space<vmem>>, vector<32x32xf32>
    %cst_12 = arith.constant dense<0.000000e+00> : vector<16x32xf32>
    %10 = tpu.matmul %8, %9, %cst_12 {dimension_numbers = #tpu.dot_dimension_numbers<[1], [0], [0], [1], [0, 0, 1, 1], [], []>} : vector<16x32xf32>, vector<32x32xf32>, vector<16x32xf32> -> vector<16x32xf32>
    %c1 = arith.constant 1 : index
    %c0_13 = arith.constant 0 : index
    %c0_14 = arith.constant 0 : index
    %11 = vector.load %arg7[%c1, %c0_13, %c0_14] : memref<3x1x32xf32, #tpu.memory_space<vmem>>, vector<1x1x32xf32>
    %12 = vector.shape_cast %11 : vector<1x1x32xf32> to vector<1x32xf32>
    %13 = vector.broadcast %12 : vector<1x32xf32> to vector<16x32xf32>
    %14 = arith.addf %10, %13 : vector<16x32xf32>
    %c0_15 = arith.constant 0 : index
    %c0_16 = arith.constant 0 : index
    %15 = vector.load %arg9[%c0_15, %c0_16] : memref<16x32xf32, #tpu.memory_space<vmem>>, vector<16x32xf32>
    tpu.vector_store %arg9[%c0_15, %c0_16], %14 {strides = array<i32>} : memref<16x32xf32, #tpu.memory_space<vmem>>, vector<16x32xf32>,
    %c0_17 = arith.constant 0 : index
    %c0_18 = arith.constant 0 : index
    %16 = vector.load %arg3[%c0_17, %c0_18] : memref<16x32xf32, #tpu.memory_space<vmem>>, vector<16x32xf32>
    %c0_19 = arith.constant 0 : index
    %c0_20 = arith.constant 0 : index
    %17 = vector.load %arg6[%c0_19, %c0_20] : memref<32x32xf32, #tpu.memory_space<vmem>>, vector<32x32xf32>
    %cst_21 = arith.constant dense<0.000000e+00> : vector<16x32xf32>
    %18 = tpu.matmul %16, %17, %cst_21 {dimension_numbers = #tpu.dot_dimension_numbers<[1], [0], [0], [1], [0, 0, 1, 1], [], []>} : vector<16x32xf32>, vector<32x32xf32>, vector<16x32xf32> -> vector<16x32xf32>
    %c2 = arith.constant 2 : index
    %c0_22 = arith.constant 0 : index
    %c0_23 = arith.constant 0 : index
    %19 = vector.load %arg7[%c2, %c0_22, %c0_23] : memref<3x1x32xf32, #tpu.memory_space<vmem>>, vector<1x1x32xf32>
    %20 = vector.shape_cast %19 : vector<1x1x32xf32> to vector<1x32xf32>
    %21 = vector.broadcast %20 : vector<1x32xf32> to vector<16x32xf32>
    %22 = arith.addf %18, %21 : vector<16x32xf32>
    %c0_24 = arith.constant 0 : index
    %c0_25 = arith.constant 0 : index
    %23 = vector.load %arg10[%c0_24, %c0_25] : memref<16x32xf32, #tpu.memory_space<vmem>>, vector<16x32xf32>
    tpu.vector_store %arg10[%c0_24, %c0_25], %22 {strides = array<i32>} : memref<16x32xf32, #tpu.memory_space<vmem>>, vector<16x32xf32>,
    return
  }
  func.func @transform_0(%arg0: i32) -> (i32, i32) {
    %c0_i32 = arith.constant 0 : i32
    %c0_i32_0 = arith.constant 0 : i32
    return %arg0, %c0_i32 : i32, i32
  }
  func.func @transform_1(%arg0: i32) -> (i32, i32) {
    %c0_i32 = arith.constant 0 : i32
    %c0_i32_0 = arith.constant 0 : i32
    return %arg0, %c0_i32 : i32, i32
  }
  func.func @transform_2(%arg0: i32) -> (i32, i32) {
    %c0_i32 = arith.constant 0 : i32
    %c0_i32_0 = arith.constant 0 : i32
    return %arg0, %c0_i32 : i32, i32
  }
  func.func @transform_3(%arg0: i32) -> (i32, i32) {
    %c0_i32 = arith.constant 0 : i32
    %c0_i32_0 = arith.constant 0 : i32
    %c0_i32_1 = arith.constant 0 : i32
    return %c0_i32, %c0_i32_0 : i32, i32
  }
  func.func @transform_4(%arg0: i32) -> (i32, i32) {
    %c0_i32 = arith.constant 0 : i32
    %c0_i32_0 = arith.constant 0 : i32
    %c0_i32_1 = arith.constant 0 : i32
    return %c0_i32, %c0_i32_0 : i32, i32
  }
  func.func @transform_5(%arg0: i32) -> (i32, i32) {
    %c0_i32 = arith.constant 0 : i32
    %c0_i32_0 = arith.constant 0 : i32
    %c0_i32_1 = arith.constant 0 : i32
    return %c0_i32, %c0_i32_0 : i32, i32
  }
  func.func @transform_6(%arg0: i32) -> (i32, i32, i32) {
    %c0_i32 = arith.constant 0 : i32
    %c0_i32_0 = arith.constant 0 : i32
    %c0_i32_1 = arith.constant 0 : i32
    %c0_i32_2 = arith.constant 0 : i32
    return %c0_i32, %c0_i32_0, %c0_i32_1 : i32, i32, i32
  }
  func.func @transform_7(%arg0: i32) -> (i32, i32) {
    %c0_i32 = arith.constant 0 : i32
    %c0_i32_0 = arith.constant 0 : i32
    return %arg0, %c0_i32 : i32, i32
  }
  func.func @transform_8(%arg0: i32) -> (i32, i32) {
    %c0_i32 = arith.constant 0 : i32
    %c0_i32_0 = arith.constant 0 : i32
    return %arg0, %c0_i32 : i32, i32
  }
  func.func @transform_9(%arg0: i32) -> (i32, i32) {
    %c0_i32 = arith.constant 0 : i32
    %c0_i32_0 = arith.constant 0 : i32
    return %arg0, %c0_i32 : i32, i32
  }
}

</mosaic_0001>

<bundles_post_ra>
// kernel: tpu_custom_call.1
= control target key start
LH: loop header
LB: loop body
LE: loop exit
PB: predicated region body
PF: predicated region fallthrough
CT: control target
= control target key end

     0   :  { %15 = vsyncpa [#allocation3], 0  ;;  %s1049_s0 = inlined_call_operand.hbm [shape: f32[16,32], index: 0, kind: input, shape index: {}]   ;;  %s1050_s1 = inlined_call_operand.hbm [shape: f32[16,32], index: 1, kind: input, shape index: {}]   ;;  %s1051_s2 = inlined_call_operand.hbm [shape: f32[16,32], index: 2, kind: input, shape index: {}]   ;;  %s1052_s3 = inlined_call_operand.hbm [shape: f32[32,32], index: 3, kind: input, shape index: {}]   ;;  %s1053_s4 = inlined_call_operand.hbm [shape: f32[32,32], index: 4, kind: input, shape index: {}]   ;;  %s1054_s5 = inlined_call_operand.hbm [shape: f32[32,32], index: 5, kind: input, shape index: {}]   ;;  %s1055_s6 = inlined_call_operand.hbm [shape: f32[3,1,32], index: 6, kind: input, shape index: {}]   ;;  %s1056_s7 = inlined_call_operand.hbm [shape: f32[16,32], index: 7, kind: output, shape index: {0}]   ;;  %s1057_s8 = inlined_call_operand.hbm [shape: f32[16,32], index: 8, kind: output, shape index: {1}]   ;;  %s1058_s9 = inlined_call_operand.hbm [shape: f32[16,32], index: 9, kind: output, shape index: {2}]  }
   0x1   :  { %16 = vsyncpa [#allocation6], 0 }
   0x2   :  { %17 = vsyncpa [#allocation9], 0 }
   0x3   :  { %18 = vsyncpa [#allocation12], 0 }
   0x4   :  { %19 = vsyncpa [#allocation4], 0 }
   0x5   :  { %20 = vsyncpa [#allocation16], 0  ;;  %s798_s30 = smov [#allocation5]   ;;  %s799_s11 = smov [#allocation8]  }
   0x6   :  { %s38_s10 = sshll.u32 %s798_s30, 4  ;;  %s62_s12 = sshll.u32 %s799_s11, 4  ;;  %s39_s10 = int_to_ptr.vmem [resolvable:$true] %s38_s10  ;;  %s862_s12 = int_to_ptr.vmem [resolvable:$true] %s62_s12 }
   0x7   :  { %s566_s15 = scalar_lea.hbm %s1050_s1, 256 }
   0x8   :  { %p567_p0 = scmp.ne.s32.totalorder %s1050_s1, %s566_s15  ;;  %p570_p1 = scmp.lt.u32.totalorder %s566_s15, %s1050_s1 }
   0xa   :  { %p572_p2 = pnand %p570_p1, %p567_p0 }
   0xc   :  { %575 = shalt.err (!%p572_p2)
}
   0xd   :  { %s576_s20 = scalar_lea.vmem %s39_s10, 256  ;;  %p581_p4 = scmp.lt.s32.totalorder %s39_s10, %s39_s10 }
   0xe   :  { %p577_p3 = scmp.ne.s32.totalorder %s39_s10, %s576_s20  ;;  %p582_p5 = scmp.lt.s32.totalorder %s576_s20, %s576_s20 }
  0x10   :  { %p583_p6 = por %p582_p5, %p581_p4 }
  0x12   :  { %p584_p7 = pnand %p583_p6, %p577_p3 }
  0x14   :  { %587 = shalt.err (!%p584_p7)
}
  0x15   :  { %s800_s21 = smov 128   ;;  %s801_s22 = smov 8  }
  0x16   :  { %44 = dma.hbm_to_vmem [thread:$0]  %s1050_s1, 256, %s39_s10, [#allocation6], %s800_s21, %s800_s21, %s801_s22  }
  0x17   :  { %s588_s27 = scalar_lea.hbm %s1052_s3, 512 }
  0x18   :  { %p589_p8 = scmp.ne.s32.totalorder %s1052_s3, %s588_s27  ;;  %p592_p9 = scmp.lt.u32.totalorder %s588_s27, %s1052_s3 }
  0x1a   :  { %p594_p10 = pnand %p592_p9, %p589_p8 }
  0x1c   :  { %597 = shalt.err (!%p594_p10)
}
  0x1d   :  { %s598_s13 = scalar_lea.vmem %s862_s12, 512  ;;  %p603_p12 = scmp.lt.s32.totalorder %s862_s12, %s862_s12 }
  0x1e   :  { %p599_p11 = scmp.ne.s32.totalorder %s862_s12, %s598_s13  ;;  %p604_p13 = scmp.lt.s32.totalorder %s598_s13, %s598_s13 }
  0x20   :  { %p605_p0 = por %p604_p13, %p603_p12 }
  0x22   :  { %p606_p1 = pnand %p605_p0, %p599_p11 }
  0x24   :  { %609 = shalt.err (!%p606_p1)
}
  0x25   :  { %68 = dma.hbm_to_vmem [thread:$0]  %s1052_s3, 512, %s862_s12, [#allocation9], %s800_s21, %s800_s21, %s801_s22  }
  0x26   :  { %s802_s14 = smov [#allocation11]   ;;  %s803_s16 = smov [#allocation2]  }
  0x27   :  { %s86_s15 = sshll.u32 %s802_s14, 4  ;;  %s26_s17 = sshll.u32 %s803_s16, 4  ;;  %s87_s15 = int_to_ptr.vmem [resolvable:$true] %s86_s15  ;;  %s899_s17 = int_to_ptr.vmem [resolvable:$true] %s26_s17 }
  0x28   :  { %s610_s20 = scalar_lea.hbm %s1054_s5, 512 }
  0x29   :  { %p611_p2 = scmp.ne.s32.totalorder %s1054_s5, %s610_s20  ;;  %p614_p3 = scmp.lt.u32.totalorder %s610_s20, %s1054_s5 }
  0x2b   :  { %p616_p4 = pnand %p614_p3, %p611_p2 }
  0x2d   :  { %619 = shalt.err (!%p616_p4)
}
  0x2e   :  { %s620_s3 = scalar_lea.vmem %s87_s15, 512  ;;  %p625_p6 = scmp.lt.s32.totalorder %s87_s15, %s87_s15 }
  0x2f   :  { %p621_p5 = scmp.ne.s32.totalorder %s87_s15, %s620_s3  ;;  %p626_p7 = scmp.lt.s32.totalorder %s620_s3, %s620_s3 }
  0x31   :  { %p627_p8 = por %p626_p7, %p625_p6 }
  0x33   :  { %p628_p9 = pnand %p627_p8, %p621_p5 }
  0x35   :  { %631 = shalt.err (!%p628_p9)
}
  0x36   :  { %92 = dma.hbm_to_vmem [thread:$0]  %s1054_s5, 512, %s87_s15, [#allocation12], %s800_s21, %s800_s21, %s801_s22  }
  0x37   :  { %s632_s30 = scalar_lea.hbm %s1049_s0, 256 }
  0x38   :  { %p633_p10 = scmp.ne.s32.totalorder %s1049_s0, %s632_s30  ;;  %p636_p11 = scmp.lt.u32.totalorder %s632_s30, %s1049_s0 }
  0x3a   :  { %p638_p12 = pnand %p636_p11, %p633_p10 }
  0x3c   :  { %641 = shalt.err (!%p638_p12)
}
  0x3d   :  { %s642_s14 = scalar_lea.vmem %s899_s17, 256  ;;  %p647_p0 = scmp.lt.s32.totalorder %s899_s17, %s899_s17 }
  0x3e   :  { %p643_p13 = scmp.ne.s32.totalorder %s899_s17, %s642_s14  ;;  %p648_p1 = scmp.lt.s32.totalorder %s642_s14, %s642_s14 }
  0x40   :  { %p649_p2 = por %p648_p1, %p647_p0 }
  0x42   :  { %p650_p3 = pnand %p649_p2, %p643_p13 }
  0x44   :  { %653 = shalt.err (!%p650_p3)
}
  0x45   :  { %32 = dma.hbm_to_vmem [thread:$0]  %s1049_s0, 256, %s899_s17, [#allocation3], %s800_s21, %s800_s21, %s801_s22  }
  0x46   :  { %s804_s16 = smov [#allocation7]   ;;  %s805_s19 = smov [#allocation10]  }
  0x47   :  { %s50_s18 = sshll.u32 %s804_s16, 4  ;;  %s74_s20 = sshll.u32 %s805_s19, 4  ;;  %s51_s18 = int_to_ptr.vmem [resolvable:$true] %s50_s18  ;;  %s936_s20 = int_to_ptr.vmem [resolvable:$true] %s74_s20 }
  0x48   :  { %s654_s25 = scalar_lea.hbm %s1051_s2, 256 }
  0x49   :  { %p655_p4 = scmp.ne.s32.totalorder %s1051_s2, %s654_s25  ;;  %p658_p5 = scmp.lt.u32.totalorder %s654_s25, %s1051_s2 }
  0x4b   :  { %p660_p6 = pnand %p658_p5, %p655_p4 }
  0x4d   :  { %663 = shalt.err (!%p660_p6)
}
  0x4e   :  { %s664_s0 = scalar_lea.vmem %s51_s18, 256  ;;  %p669_p8 = scmp.lt.s32.totalorder %s51_s18, %s51_s18 }
  0x4f   :  { %p665_p7 = scmp.ne.s32.totalorder %s51_s18, %s664_s0  ;;  %p670_p9 = scmp.lt.s32.totalorder %s664_s0, %s664_s0 }
  0x51   :  { %p671_p10 = por %p670_p9, %p669_p8 }
  0x53   :  { %p672_p11 = pnand %p671_p10, %p665_p7 }
  0x55   :  { %675 = shalt.err (!%p672_p11)
}
  0x56   :  { %56 = dma.hbm_to_vmem [thread:$0]  %s1051_s2, 256, %s51_s18, [#allocation6], %s800_s21, %s800_s21, %s801_s22  }
  0x57   :  { %s676_s11 = scalar_lea.hbm %s1053_s4, 512 }
  0x58   :  { %p677_p12 = scmp.ne.s32.totalorder %s1053_s4, %s676_s11  ;;  %p680_p13 = scmp.lt.u32.totalorder %s676_s11, %s1053_s4 }
  0x5a   :  { %p682_p0 = pnand %p680_p13, %p677_p12 }
  0x5c   :  { %685 = shalt.err (!%p682_p0)
}
  0x5d   :  { %s686_s5 = scalar_lea.vmem %s936_s20, 512  ;;  %p691_p2 = scmp.lt.s32.totalorder %s936_s20, %s936_s20 }
  0x5e   :  { %p687_p1 = scmp.ne.s32.totalorder %s936_s20, %s686_s5  ;;  %p692_p3 = scmp.lt.s32.totalorder %s686_s5, %s686_s5 }
  0x60   :  { %p693_p4 = por %p692_p3, %p691_p2 }
  0x62   :  { %p694_p5 = pnand %p693_p4, %p687_p1 }
  0x64   :  { %697 = shalt.err (!%p694_p5)
}
  0x65   :  { %80 = dma.hbm_to_vmem [thread:$0]  %s1053_s4, 512, %s936_s20, [#allocation9], %s800_s21, %s800_s21, %s801_s22  }
  0x66   :  { %s806_s16 = smov [#allocation13]   ;;  %s698_s24 = scalar_lea.hbm %s1055_s6, 48 }
  0x67   :  { %s98_s18 = sshll.u32 %s806_s16, 4  ;;  %p699_p6 = scmp.ne.s32.totalorder %s1055_s6, %s698_s24  ;;  %s99_s18 = int_to_ptr.vmem [resolvable:$true] %s98_s18 }
  0x68   :  { %p702_p7 = scmp.lt.u32.totalorder %s698_s24, %s1055_s6 }
  0x6a   :  { %p704_p8 = pnand %p702_p7, %p699_p6 }
  0x6c   :  { %707 = shalt.err (!%p704_p8)
}
  0x6d   :  { %s708_s27 = scalar_lea.vmem %s99_s18, 48  ;;  %s712_s4 = scalar_lea.vmem %s99_s18, 64 }
  0x6e   :  { %p709_p9 = scmp.ne.s32.totalorder %s99_s18, %s708_s27  ;;  %p713_p10 = scmp.lt.s32.totalorder %s99_s18, %s99_s18 }
  0x6f   :  { %p714_p11 = scmp.lt.s32.totalorder %s712_s4, %s708_s27 }
  0x71   :  { %p715_p12 = por %p714_p11, %p713_p10 }
  0x73   :  { %p716_p13 = pnand %p715_p12, %p709_p9 }
  0x75   :  { %719 = shalt.err (!%p716_p13)
}
  0x76   :  { %s807_s20 = smov 16   ;;  %s808_s0 = smov 1  }
  0x77   :  { %104 = dma.hbm_to_vmem [thread:$0]  %s1055_s6, 48, %s99_s18, [#allocation12], %s807_s20, %s807_s20, %s808_s0  }
  0x78   :  { %786 = dma.done.wait [#allocation3], 256  }
  0x79   :  { %787 = vsyncadd [#allocation3], 4294967040 }
  0x7a   :  { %788 = dma.done.wait [#allocation6], 512  }
  0x7b   :  { %789 = vsyncadd [#allocation6], 4294966784 }
  0x7c   :  { %790 = dma.done.wait [#allocation9], 1024  }
  0x7d   :  { %791 = vsyncadd [#allocation9], 4294966272 }
  0x7e   :  { %792 = dma.done.wait [#allocation12], 560  }
  0x7f   :  { %793 = vsyncadd [#allocation12], 4294966736  ;;  %v128_v0 = vld [vmem:[#allocation8] sm:$0xff]  ;;  %v129_v1 = vld [vmem:[#allocation8 + $0x8] sm:$0xff]  ;;  %vm139_vm0 = vcmask 261120   ;;  %s809_s6 = smov [#allocation14]  }
  0x80   :  { %v130_v2 = vld [vmem:[#allocation8 + $0x10] sm:$0xff]  ;;  %v528_v3 = vpack.c.bf16 %v129_v1, %v128_v0  ;;  %v131_v4 = vld [vmem:[#allocation8 + $0x18] sm:$0xff]  ;;  %v225_v5 = vld [vmem:[#allocation10] sm:$0xff]  ;;  %s422_s29 = sshll.u32 %s809_s6, 4  ;;  %s810_s30 = smov [#allocation15]   ;;  %s423_s29 = int_to_ptr.vmem [resolvable:$true] %s422_s29 }
  0x81   :  { %v226_v6 = vld [vmem:[#allocation10 + $0x8] sm:$0xff]  ;;  %v532_v7 = vpack.c.bf16 %v131_v4, %v130_v2  ;;  %v126_v9 = vld [vmem:[#allocation2] sm:$0xff]  ;;  %v322_v10 = vld [vmem:[#allocation11] sm:$0xff]  ;;  %s434_s11 = sshll.u32 %s810_s30, 4  ;;  %s720_s13 = scalar_lea.vmem %s423_s29, 256  ;;  %s992_s11 = int_to_ptr.vmem [resolvable:$true] %s434_s11 }
  0x82   :  { %v536_v8 = vpack.c.bf16 %v226_v6, %v225_v5  ;;  %529 = vmatprep.subr.bf16.mxu0 %v528_v3  ;;  %503 = vmatprep.mubr.msk.f32.mxu0 %vm139_vm0, %v126_v9  ;;  %v323_v11 = vld [vmem:[#allocation11 + $0x8] sm:$0xff]  ;;  %v227_v12 = vld [vmem:[#allocation10 + $0x10] sm:$0xff]  ;;  %v228_v13 = vld [vmem:[#allocation10 + $0x18] sm:$0xff]  ;;  %p721_p0 = scmp.ne.s32.totalorder %s423_s29, %s720_s13  ;;  %p725_p1 = scmp.lt.s32.totalorder %s423_s29, %s423_s29 }
  0x83   :  { %531 = vmatpush3.bf16.msra.mxu0 %v528_v3  ;;  %v540_v14 = vpack.c.bf16 %v228_v13, %v227_v12  ;;  %v223_v15 = vld [vmem:[#allocation5] sm:$0xff]  ;;  %v544_v16 = vpack.c.bf16 %v323_v11, %v322_v10  ;;  %v324_v17 = vld [vmem:[#allocation11 + $0x10] sm:$0xff]  ;;  %v325_v18 = vld [vmem:[#allocation11 + $0x18] sm:$0xff]  ;;  %p726_p2 = scmp.lt.s32.totalorder %s720_s13, %s720_s13 }
  0x84   :  { %537 = vmatprep.subr.bf16.mxu1 %v536_v8  ;;  %533 = vmatprep.subr.bf16.mxu0 %v532_v7  ;;  %v127_v19 = vld [vmem:[#allocation2 + $0x8] sm:$0xff]  ;;  %v548_v20 = vpack.c.bf16 %v325_v18, %v324_v17  ;;  %v224_v21 = vld [vmem:[#allocation5 + $0x8] sm:$0xff]  ;;  %v320_v22 = vld [vmem:[#allocation7] sm:$0xff] }
  0x85   :  { %539 = vmatpush3.bf16.msra.mxu1 %v536_v8  ;;  %514 = vmatprep.mubr.msk.f32.mxu1 %vm139_vm0, %v223_v15  ;;  %v321_v23 = vld [vmem:[#allocation7 + $0x8] sm:$0xff]  ;;  %v468_v24 = vld [vmem:[#allocation13] ss:$0 sm:$0xff]  ;;  %v471_v25 = vld [vmem:[#allocation13 + $0x1] ss:$0 sm:$0xff]  ;;  %p727_p3 = por %p726_p2, %p725_p1 }
  0x86   :  { %541 = vmatprep.subr.bf16.mxu1 %v540_v14 }
  0x87   :  { %535 = vmatpush3.bf16.msra.mxu0 %v532_v7  ;;  %p728_p4 = pnand %p727_p3, %p721_p0 }
  0x88   :  { %545 = vmatprep.subr.bf16.mxu0 %v544_v16 }
  0x89   :  { %543 = vmatpush3.bf16.msra.mxu1 %v540_v14 }
  0x8a   :  { %504 = vmatmul.mubr.msk.f32.vlgmr.msra.gmra.mrb[0].mxu0 %vm139_vm0, %v127_v19 }
  0x8b   :  { %547 = vmatpush3.bf16.msra.mxu0 %v544_v16  ;;  %525 = vmatprep.mubr.msk.f32.mxu0 %vm139_vm0, %v320_v22 }
  0x8c   :  { %515 = vmatmul.mubr.msk.f32.vlgmr.msra.gmra.mrb[0].mxu1 %vm139_vm0, %v224_v21  ;;  %549 = vmatprep.subr.bf16.mxu0 %v548_v20 }
  0x8f   :  { %551 = vmatpush3.bf16.msra.mxu0 %v548_v20 }
  0x92   :  { %526 = vmatmul.mubr.msk.f32.vlgmr.msra.gmra.mrb[2].mxu0 %vm139_vm0, %v321_v23 }
 0x15d   :  { %v505_v26 = vpop.f32.mrb[0].mxu0 }
 0x15e   :  { %v218_v27 = vadd.f32 %v505_v26, %v468_v24  ;;  %v212_v28 = vpop.f32.mrb[1].mxu0 }
 0x15f   :  { %v516_v29 = vpop.f32.mrb[0].mxu1  ;;  %v213_v30 = vadd.f32 %v468_v24, %v212_v28 }
 0x160   :  { %v315_v31 = vadd.f32 %v516_v29, %v471_v25  ;;  %v309_v32 = vpop.f32.mrb[1].mxu1  ;;  %222 = vst.msk [vmem:[#allocation14 + $0x8] sm:$0xff] %vm139_vm0, %v218_v27 }
 0x161   :  { %v310_v33 = vadd.f32 %v471_v25, %v309_v32  ;;  %221 = vst.msk [vmem:[#allocation14] sm:$0xff] %vm139_vm0, %v213_v30 }
 0x162   :  { %319 = vst.msk [vmem:[#allocation15 + $0x8] sm:$0xff] %vm139_vm0, %v315_v31 }
 0x163   :  { %318 = vst.msk [vmem:[#allocation15] sm:$0xff] %vm139_vm0, %v310_v33 }
 0x164   :  { %731 = shalt.err (!%p728_p4)
}
 0x165   :  { %s732_s14 = scalar_lea.hbm %s1056_s7, 256 }
 0x166   :  { %p733_p5 = scmp.ne.s32.totalorder %s1056_s7, %s732_s14  ;;  %p736_p6 = scmp.lt.u32.totalorder %s732_s14, %s1056_s7 }
 0x168   :  { %p738_p7 = pnand %p736_p6, %p733_p5 }
 0x16a   :  { %741 = shalt.err (!%p738_p7)
}
 0x16b   :  { %428 = dma.vmem_to_hbm [thread:$0]  %s423_s29, 256, %s1056_s7, [#allocation4], %s800_s21, %s800_s21, %s801_s22   ;;  %v474_v34 = vld [vmem:[#allocation13 + $0x2] ss:$0 sm:$0xff] }
 0x16c   :  { %s742_s23 = scalar_lea.vmem %s992_s11, 256  ;;  %p747_p9 = scmp.lt.s32.totalorder %s992_s11, %s992_s11 }
 0x16d   :  { %p743_p8 = scmp.ne.s32.totalorder %s992_s11, %s742_s23  ;;  %p748_p10 = scmp.lt.s32.totalorder %s742_s23, %s742_s23 }
 0x16f   :  { %p749_p11 = por %p748_p10, %p747_p9 }
 0x171   :  { %p750_p12 = pnand %p749_p11, %p743_p8 }
 0x173   :  { %753 = shalt.err (!%p750_p12)
}
 0x174   :  { %s754_s26 = scalar_lea.hbm %s1057_s8, 256 }
 0x175   :  { %p755_p13 = scmp.ne.s32.totalorder %s1057_s8, %s754_s26  ;;  %p758_p0 = scmp.lt.u32.totalorder %s754_s26, %s1057_s8 }
 0x177   :  { %p760_p1 = pnand %p758_p0, %p755_p13 }
 0x179   :  { %763 = shalt.err (!%p760_p1)
}
 0x17a   :  { %440 = dma.vmem_to_hbm [thread:$0]  %s992_s11, 256, %s1057_s8, [#allocation16], %s800_s21, %s800_s21, %s801_s22   ;;  %v527_v35 = vpop.f32.mrb[2].mxu0 }
 0x17b   :  { %s811_s0 = smov [#allocation17]   ;;  %v412_v36 = vadd.f32 %v527_v35, %v474_v34  ;;  %v406_v37 = vpop.f32.mrb[3].mxu0 }
 0x17c   :  { %s446_s17 = sshll.u32 %s811_s0, 4  ;;  %v407_v38 = vadd.f32 %v474_v34, %v406_v37  ;;  %s447_s17 = int_to_ptr.vmem [resolvable:$true] %s446_s17 }
 0x17d   :  { %416 = vst.msk [vmem:[#allocation17 + $0x8] sm:$0xff] %vm139_vm0, %v412_v36  ;;  %s764_s28 = scalar_lea.vmem %s447_s17, 256  ;;  %p769_p3 = scmp.lt.s32.totalorder %s447_s17, %s447_s17 }
 0x17e   :  { %415 = vst.msk [vmem:[#allocation17] sm:$0xff] %vm139_vm0, %v407_v38  ;;  %p765_p2 = scmp.ne.s32.totalorder %s447_s17, %s764_s28  ;;  %p770_p4 = scmp.lt.s32.totalorder %s764_s28, %s764_s28 }
 0x180   :  { %p771_p5 = por %p770_p4, %p769_p3 }
 0x182   :  { %p772_p6 = pnand %p771_p5, %p765_p2 }
 0x184   :  { %775 = shalt.err (!%p772_p6)
}
 0x185   :  { %s776_s29 = scalar_lea.hbm %s1058_s9, 256 }
 0x186   :  { %p777_p7 = scmp.ne.s32.totalorder %s1058_s9, %s776_s29  ;;  %p780_p8 = scmp.lt.u32.totalorder %s776_s29, %s1058_s9 }
 0x188   :  { %p782_p9 = pnand %p780_p8, %p777_p7 }
 0x18a   :  { %785 = shalt.err (!%p782_p9)
}
 0x18b   :  { %452 = dma.vmem_to_hbm [thread:$0]  %s447_s17, 256, %s1058_s9, [#allocation16], %s800_s21, %s800_s21, %s801_s22  }
 0x18c   :  { %794 = dma.done.wait [#allocation4], 256  }
 0x18d   :  { %795 = vsyncadd [#allocation4], 4294967040 }
 0x18e   :  { %796 = dma.done.wait [#allocation16], 512  }
 0x18f   :  { %797 = vsyncadd [#allocation16], 4294966784 }
 0x190   :  { %462 = vsyncpa [#allocation3], 1 }
 0x191   :  { %463 = vsyncpa [#allocation6], 1 }
 0x192   :  { %464 = vsyncpa [#allocation9], 1 }
 0x193   :  { %465 = vsyncpa [#allocation12], 1 }
 0x194   :  { %466 = vsyncpa [#allocation4], 1 }
 0x195   :  { %467 = vsyncpa [#allocation16], 1 }

</bundles_post_ra>
